<compile_context>
chip_gen: v6e
topology: v6e:2x2x1
jax: 0.10.0
libtpu: 0.0.40
codegen_flags: <defaults>
</compile_context>

<pallas_src>
import functools

import jax
import jax.numpy as jnp
from jax import lax
from jax.experimental import pallas as pl
from jax.experimental.pallas import tpu as pltpu


# ---------------------------------------------------------------------------
# Kernels
# ---------------------------------------------------------------------------
def _panel(feat_ref, *, tk, k_total, ragged):
    """Load the current (M, tk) feature panel, zero-masking ragged tail columns."""
    f = feat_ref[...]
    if ragged:
        kk = pl.program_id(0)
        valid = k_total - kk * tk                      # >= tk except on the last step
        col = lax.broadcasted_iota(jnp.int32, f.shape, 1)
        f = jnp.where(col < valid, f, jnp.zeros_like(f))
    return f


def _gram_kernel(feat_ref, g_ref, *, scale, tk, k_total, ragged):
    """Accumulate F_k @ F_k^T over K panels into the resident (M, M) f32 output."""
    k = pl.program_id(0)

    @pl.when(k == 0)
    def _():
        g_ref[...] = jnp.zeros_like(g_ref)

    f = _panel(feat_ref, tk=tk, k_total=k_total, ragged=ragged)
    g_ref[...] += lax.dot_general(
        f, f,
        dimension_numbers=(((1,), (1,)), ((), ())),    # contract last dim of both
        preferred_element_type=jnp.float32,
    )

    @pl.when(k == pl.num_programs(0) - 1)
    def _():
        g_ref[...] = g_ref[...] * scale


def _style_loss_kernel(feat_ref, tgt_ref, loss_ref, acc_ref,
                       *, scale, inv_mm, tk, k_total, ragged):
    """Fused gram + MSE.  Gram stays in VMEM scratch; only the scalar loss is output."""
    k = pl.program_id(0)

    @pl.when(k == 0)
    def _():
        acc_ref[...] = jnp.zeros_like(acc_ref)

    f = _panel(feat_ref, tk=tk, k_total=k_total, ragged=ragged)
    acc_ref[...] += lax.dot_general(
        f, f,
        dimension_numbers=(((1,), (1,)), ((), ())),
        preferred_element_type=jnp.float32,
    )

    @pl.when(k == pl.num_programs(0) - 1)
    def _():
        g = acc_ref[...] * scale
        diff = g - tgt_ref[...].astype(jnp.float32)
        loss_ref[0, 0] = jnp.sum(diff * diff) * inv_mm


# ---------------------------------------------------------------------------
# Tiling / compiler-params helpers
# ---------------------------------------------------------------------------
def _choose_tiling(m, k, itemsize, panel_bytes):
    """Return (tk, num_steps, ragged) for streaming (m, k) features in (m, tk) panels."""
    cap = max(128, panel_bytes // max(m * itemsize, 1))
    cap -= cap % 128
    if k <= cap:
        return k, 1, False                              # single full-K panel
    for tk in range(cap, 127, -128):                    # largest lane-aligned divisor
        if k % tk == 0:
            return tk, k // tk, False
    tk = cap                                            # ragged tail, masked in-kernel
    return tk, pl.cdiv(k, tk), True


def _compiler_params(m, tk, itemsize):
    # 2x double-buffered (M, tk) input panel + f32 accumulator + (2x) f32 target.
    need = 2 * m * tk * itemsize + 3 * m * m * 4
    limit = int(min(max(need + (16 << 20), 32 << 20), 64 << 20))
    return pltpu.CompilerParams(
        dimension_semantics=("arbitrary",),             # K is a reduction axis
        vmem_limit_bytes=limit,
    )


# ---------------------------------------------------------------------------
# Wrappers (reshape NCHW -> (b*c, h*w) and pallas_call plumbing)
# ---------------------------------------------------------------------------
_DEFAULT_PANEL_BYTES = 4 << 20   # ~4 MiB streamed panel (x2 double-buffered)


def gram_matrix(x, *, _panel_bytes=_DEFAULT_PANEL_BYTES):
    """G = F @ F^T / (b*c*h*w) with F = x.reshape(b*c, h*w).  Output is f32."""
    b, c, h, w = x.shape
    m, k = b * c, h * w
    feats = x.reshape(m, k)                             # native dtype, no upcast
    tk, steps, ragged = _choose_tiling(m, k, feats.dtype.itemsize, _panel_bytes)
    scale = 1.0 / float(b * c * h * w)
    return pl.pallas_call(
        functools.partial(_gram_kernel, scale=scale, tk=tk, k_total=k, ragged=ragged),
        out_shape=jax.ShapeDtypeStruct((m, m), jnp.float32),
        grid=(steps,),
        in_specs=[pl.BlockSpec((m, tk), lambda kk: (0, kk))],
        out_specs=pl.BlockSpec((m, m), lambda kk: (0, 0)),   # resident accumulator
        compiler_params=_compiler_params(m, tk, feats.dtype.itemsize),
    )(feats)


class StyleLoss:
    """JAX/Pallas port of the PyTorch StyleLoss module (forward pass)."""

    def __init__(self, target_feature, *, _panel_bytes=_DEFAULT_PANEL_BYTES):
        # Target gram computed once at init (detached constant), stored in f32.
        self.target = gram_matrix(target_feature, _panel_bytes=_panel_bytes)
        self._panel_bytes = _panel_bytes
        self.loss = None

    def __call__(self, x):
        b, c, h, w = x.shape
        m, k = b * c, h * w
        feats = x.reshape(m, k)                         # native dtype, no upcast
        tk, steps, ragged = _choose_tiling(
            m, k, feats.dtype.itemsize, self._panel_bytes)
        scale = 1.0 / float(b * c * h * w)
        inv_mm = 1.0 / float(m * m)

        loss = pl.pallas_call(
            functools.partial(_style_loss_kernel, scale=scale, inv_mm=inv_mm,
                              tk=tk, k_total=k, ragged=ragged),
            out_shape=jax.ShapeDtypeStruct((1, 1), jnp.float32),
            grid=(steps,),
            in_specs=[
                pl.BlockSpec((m, tk), lambda kk: (0, kk)),   # streamed feature panel
                pl.BlockSpec((m, m), lambda kk: (0, 0)),     # resident target gram
            ],
            # Scalar loss: written once in the final grid step (single tiny store).
            out_specs=pl.BlockSpec((1, 1), lambda kk: (0, 0)),
            scratch_shapes=[pltpu.VMEM((m, m), jnp.float32)],  # gram accumulator
            compiler_params=_compiler_params(m, tk, feats.dtype.itemsize),
        )(feats, self.target)

        self.loss = loss[0, 0]
        # PyTorch forward returns the input unchanged (transparent layer).
        return x


# ---------------------------------------------------------------------------
# Pure-JAX reference for correctness sanity checks
# ---------------------------------------------------------------------------
def _ref_gram(x):
    b, c, h, w = x.shape
    f = x.reshape(b * c, h * w).astype(jnp.float32)
    return (f @ f.T) / float(b * c * h * w)


def _ref_loss(x, target_feature):
    G = _ref_gram(x)
    T = _ref_gram(target_feature)
    return jnp.mean((G - T) ** 2)


if __name__ == "__main__":
    key = jax.random.PRNGKey(0)
    k1, k2 = jax.random.split(key)

    # 1) Small NCHW feature maps: batch=2, channels=4, spatial 16x16 (single-panel path).
    target_feature = jax.random.normal(k1, (2, 4, 16, 16), dtype=jnp.float32)
    x = jax.random.normal(k2, (2, 4, 16, 16), dtype=jnp.float32)

    module = StyleLoss(target_feature)
    out = module(x)
    out = jax.block_until_ready(out)
    loss = jax.block_until_ready(module.loss)

    ref = _ref_loss(x, target_feature)
    assert jnp.allclose(loss, ref, rtol=1e-4, atol=1e-6), (loss, ref)
    assert out.shape == x.shape and jnp.array_equal(out, x)

    # Standalone gram_matrix kernel check.
    g_val = jax.block_until_ready(gram_matrix(x))
    assert jnp.allclose(g_val, _ref_gram(x), rtol=5e-3, atol=1e-4)

    # 2) Multi-step K-tiled path (small panel budget forces several lane-aligned panels).
    tf2 = jax.random.normal(k1, (1, 8, 32, 32), dtype=jnp.float32)   # M=8, K=1024
    x2 = jax.random.normal(k2, (1, 8, 32, 32), dtype=jnp.float32)
    mod2 = StyleLoss(tf2, _panel_bytes=16 << 10)                     # tk=512, 2 steps
    mod2(x2)
    loss2 = jax.block_until_ready(mod2.loss)
    ref2 = _ref_loss(x2, tf2)
    assert jnp.allclose(loss2, ref2, rtol=1e-3, atol=1e-6), (loss2, ref2)

    # 3) Ragged-K path (h*w = 289 has no lane-aligned divisor -> masked final panel).
    tf3 = jax.random.normal(k1, (1, 8, 17, 17), dtype=jnp.float32)   # M=8, K=289
    x3 = jax.random.normal(k2, (1, 8, 17, 17), dtype=jnp.float32)
    mod3 = StyleLoss(tf3, _panel_bytes=4 << 10)                      # tk=128, 3 steps
    mod3(x3)
    loss3 = jax.block_until_ready(mod3.loss)
    ref3 = _ref_loss(x3, tf3)
    assert jnp.allclose(loss3, ref3, rtol=1e-3, atol=1e-6), (loss3, ref3)
    g3 = jax.block_until_ready(gram_matrix(x3, _panel_bytes=4 << 10))
    assert jnp.allclose(g3, _ref_gram(x3), rtol=5e-3, atol=1e-4)

    print("KERNEL_OK")
</pallas_src>

<mosaic_0001>
module attributes {stable_mosaic.version = 11 : i64} {
  func.func @_gram_kernel(%arg0: i32, %arg1: memref<8x256xf32, #tpu.memory_space<vmem>>, %arg2: memref<8x8xf32, #tpu.memory_space<vmem>>) attributes {dimension_semantics = [#tpu.dimension_semantics<arbitrary>], iteration_bounds = array<i64: 1>, scalar_prefetch = 0 : i64, scratch_operands = 0 : i64, tpu.core_type = #tpu.core_type<tc>, window_params = [{transform_indices = @transform_0, window_bounds = array<i64: 8, 256>}, {pipeline_mode = #tpu.pipeline_mode<synchronous>, transform_indices = @transform_1, window_bounds = array<i64: 8, 8>}]} {
    %c0_i32 = arith.constant 0 : i32
    %0 = arith.cmpi eq, %arg0, %c0_i32 : i32
    %1 = arith.extui %0 : i1 to i32
    %c0_i32_0 = arith.constant 0 : i32
    %2 = arith.cmpi ne, %1, %c0_i32_0 : i32
    scf.if %2 {
      %cst_8 = arith.constant 0.000000e+00 : f32
      %11 = vector.broadcast %cst_8 : f32 to vector<8x8xf32>
      %c0_9 = arith.constant 0 : index
      %c0_10 = arith.constant 0 : index
      %12 = vector.load %arg2[%c0_9, %c0_10] : memref<8x8xf32, #tpu.memory_space<vmem>>, vector<8x8xf32>
      tpu.vector_store %arg2[%c0_9, %c0_10], %11 {strides = array<i32>} : memref<8x8xf32, #tpu.memory_space<vmem>>, vector<8x8xf32>,
    } else {
    }
    %c0 = arith.constant 0 : index
    %c0_1 = arith.constant 0 : index
    %3 = vector.load %arg1[%c0, %c0_1] : memref<8x256xf32, #tpu.memory_space<vmem>>, vector<8x256xf32>
    %c0_2 = arith.constant 0 : index
    %c0_3 = arith.constant 0 : index
    %4 = vector.load %arg2[%c0_2, %c0_3] : memref<8x8xf32, #tpu.memory_space<vmem>>, vector<8x8xf32>
    %cst = arith.constant dense<0.000000e+00> : vector<8x8xf32>
    %5 = tpu.matmul %3, %3, %cst {dimension_numbers = #tpu.dot_dimension_numbers<[1], [1], [0], [0], [0, 0, 1, 0], [], []>} : vector<8x256xf32>, vector<8x256xf32>, vector<8x8xf32> -> vector<8x8xf32>
    %6 = arith.addf %4, %5 : vector<8x8xf32>
    %c0_4 = arith.constant 0 : index
    %c0_5 = arith.constant 0 : index
    %7 = vector.load %arg2[%c0_4, %c0_5] : memref<8x8xf32, #tpu.memory_space<vmem>>, vector<8x8xf32>
    tpu.vector_store %arg2[%c0_4, %c0_5], %6 {strides = array<i32>} : memref<8x8xf32, #tpu.memory_space<vmem>>, vector<8x8xf32>,
    %c0_i32_6 = arith.constant 0 : i32
    %8 = arith.cmpi eq, %arg0, %c0_i32_6 : i32
    %9 = arith.extui %8 : i1 to i32
    %c0_i32_7 = arith.constant 0 : i32
    %10 = arith.cmpi ne, %9, %c0_i32_7 : i32
    scf.if %10 {
      %c0_8 = arith.constant 0 : index
      %c0_9 = arith.constant 0 : index
      %11 = vector.load %arg2[%c0_8, %c0_9] : memref<8x8xf32, #tpu.memory_space<vmem>>, vector<8x8xf32>
      %cst_10 = arith.constant 4.8828125E-4 : f32
      %12 = vector.broadcast %cst_10 : f32 to vector<8x8xf32>
      %13 = arith.mulf %11, %12 : vector<8x8xf32>
      %c0_11 = arith.constant 0 : index
      %c0_12 = arith.constant 0 : index
      %14 = vector.load %arg2[%c0_11, %c0_12] : memref<8x8xf32, #tpu.memory_space<vmem>>, vector<8x8xf32>
      tpu.vector_store %arg2[%c0_11, %c0_12], %13 {strides = array<i32>} : memref<8x8xf32, #tpu.memory_space<vmem>>, vector<8x8xf32>,
    } else {
    }
    return
  }
  func.func @transform_0(%arg0: i32) -> (i32, i32) {
    %c0_i32 = arith.constant 0 : i32
    %c0_i32_0 = arith.constant 0 : i32
    return %c0_i32, %arg0 : i32, i32
  }
  func.func @transform_1(%arg0: i32) -> (i32, i32) {
    %c0_i32 = arith.constant 0 : i32
    %c0_i32_0 = arith.constant 0 : i32
    %c0_i32_1 = arith.constant 0 : i32
    return %c0_i32, %c0_i32_0 : i32, i32
  }
}

</mosaic_0001>

<bundles_post_ra>
// kernel: tpu_custom_call.1
= control target key start
LH: loop header
LB: loop body
LE: loop exit
PB: predicated region body
PF: predicated region fallthrough
CT: control target
= control target key end

     0   :  { %6 = vsyncpa [#allocation3], 0  ;;  %s193_s0 = inlined_call_operand.hbm [shape: f32[8,256], index: 0, kind: input, shape index: {}]   ;;  %s194_s1 = inlined_call_operand.hbm [shape: f32[8,8], index: 1, kind: output, shape index: {}]  }
   0x1   :  { %7 = vsyncpa [#allocation4], 0  ;;  %s171_s6 = smov [#allocation2]  }
   0x2   :  { %s14_s7 = sshll.u32 %s171_s6, 4  ;;  %s15_s7 = int_to_ptr.vmem [resolvable:$true] %s14_s7 }
   0x3   :  { %s135_s8 = scalar_lea.vmem %s15_s7, 256  ;;  %p140_p1 = scmp.lt.s32.totalorder %s15_s7, %s15_s7 }
   0x4   :  { %p136_p0 = scmp.ne.s32.totalorder %s15_s7, %s135_s8  ;;  %p141_p2 = scmp.lt.s32.totalorder %s135_s8, %s135_s8 }
   0x6   :  { %p142_p3 = por %p141_p2, %p140_p1 }
   0x8   :  { %p143_p4 = pnand %p142_p3, %p136_p0 }
   0xa   :  { %146 = shalt.err (!%p143_p4)
}
   0xb   :  { %17 = dma.hbm_to_vmem [thread:$0]  %s193_s0, 256, %s15_s7, [#allocation3]  }
   0xc   :  { %167 = dma.done.wait [#allocation3], 256  }
   0xd   :  { %168 = vsyncadd [#allocation3], 4294967040  ;;  %vm25_vm0 = vcmask 64512   ;;  %v172_v0 = vmov 0.0   ;;  %v28_v1 = vld [vmem:[#allocation2 + $0x8] sm:$0xff]  ;;  %v27_v2 = vld [vmem:[#allocation2] sm:$0xff] }
   0xe   :  { %26 = vst.msk [vmem:[#allocation5] sm:$0xff] %vm25_vm0, %v172_v0  ;;  %60 = vmatprep.subr.mxu0 %v28_v1  ;;  %94 = vmatprep.mubr.f32.mxu0 %v28_v1  ;;  %s173_s11 = smov [#allocation5]  }
   0xf   :  { %61 = vmatpush1.xpose.msra.mxu0 %v27_v2  ;;  %s115_s0 = sshll.u32 %s173_s11, 4  ;;  %s116_s0 = int_to_ptr.vmem [resolvable:$true] %s115_s0 }
  0x10   :  { %s147_s12 = scalar_lea.vmem %s116_s0, 128  ;;  %p152_p6 = scmp.lt.s32.totalorder %s116_s0, %s116_s0 }
  0x11   :  { %p148_p5 = scmp.ne.s32.totalorder %s116_s0, %s147_s12  ;;  %p153_p7 = scmp.lt.s32.totalorder %s147_s12, %s147_s12 }
  0x12   :  { %95 = vmatmul.mubr.f32.vlgmr.msra.gmra.mxu0 %v27_v2 }
  0x13   :  { %p154_p8 = por %p153_p7, %p152_p6 }
  0x15   :  { %v29_v3 = vld [vmem:[#allocation5] sm:$0xff]  ;;  %p155_p9 = pnand %p154_p8, %p148_p5 }
  0xd2   :  { %v96_v4 = vpop.f32.mrf.mxu0 }
  0xd3   :  { %v100_v5 = vadd.f32 %v96_v4, %v29_v3 }
  0xd4   :  { %v98_v6 = vpop.f32.mrf.mxu0 }
  0xd5   :  { %102 = vst.msk [vmem:[#allocation5] sm:$0xff] %vm25_vm0, %v100_v5 }
  0xdc   :  { %v106_v7 = vld [vmem:[#allocation5] sm:$0xff] }
  0xdd   :  { %v107_v8 = vmul.f32 0.00048828125, %v106_v7 }
  0xdf   :  { %108 = vst.msk [vmem:[#allocation5] sm:$0xff] %vm25_vm0, %v107_v8 }
  0xe0   :  { %158 = shalt.err (!%p155_p9)
}
  0xe1   :  { %118 = dma.vmem_to_hbm [thread:$0]  %s116_s0, 128, %s194_s1, [#allocation4]  }
  0xe2   :  { %169 = dma.done.wait [#allocation4], 128  }
  0xe3   :  { %170 = vsyncadd [#allocation4], 4294967168 }
  0xe4   :  { %122 = vsyncpa [#allocation3], 1 }
  0xe5   :  { %123 = vsyncpa [#allocation4], 1 }

</bundles_post_ra>
